<compile_context>
chip_gen: v5e
topology: v5e:2x2
jax: 0.10.0
libtpu: 0.0.40
codegen_flags: <defaults>
</compile_context>

<pallas_src>
import jax
import jax.numpy as jnp
from jax import lax
from jax.experimental import pallas as pl
from jax.experimental.pallas import tpu as pltpu
import numpy as np


def lstm_classifier_kernel(x_ref, wih_ref, whh_ref, b_ref, wout_ref, bout_ref,
                           out_ref, xw_sc, hs_sc):
    """Single-invocation kernel: whole LSTM recurrence + Linear + LogSoftmax in VMEM.

    x_ref    : (S, D_in)   input sequence
    wih_ref  : (D_in, 4H)  W_ih^T  (gate order i, f, g, o; g columns pre-scaled by 2)
    whh_ref  : (H, 4H)     W_hh^T  (g columns pre-scaled by 2)
    b_ref    : (1, 4H)     b_ih + b_hh (g slice pre-scaled by 2)
    wout_ref : (H, T)      hidden2tag weight^T
    bout_ref : (1, T)      hidden2tag bias
    out_ref  : (S, T)      log-softmax scores (pre-transpose)
    xw_sc    : (S, 4H)     scratch: precomputed input projection
    hs_sc    : (S, H)      scratch: all hidden states
    """
    S = x_ref.shape[0]
    H = whh_ref.shape[0]

    # ---- Hoisted out of the recurrence ------------------------------------
    # Input projection for all timesteps in one MXU matmul + bias add.
    xw_sc[...] = (jnp.dot(x_ref[...], wih_ref[...],
                          preferred_element_type=jnp.float32)
                  + b_ref[...])                                  # (S, 4H)
    # Recurrent weight loaded into vregs once (only 4 vregs at H=32).
    whh = whh_ref[...]                                           # (H, 4H)

    h0 = jnp.zeros((1, H), dtype=jnp.float32)
    c0 = jnp.zeros((1, H), dtype=jnp.float32)

    # ---- Serial recurrence (fully unrolled, h/c live in vregs) ------------
    def step(t, carry):
        h, c = carry
        gates = (xw_sc[pl.ds(t, 1), :]
                 + jnp.dot(h, whh, preferred_element_type=jnp.float32))   # (1, 4H)
        # One full-vreg sigmoid; tanh recovered via tanh(x) = 2*sigmoid(2x) - 1
        # (the g-gate pre-activation columns were pre-scaled by 2 in the wrapper).
        sig = jax.nn.sigmoid(gates)
        i_g = sig[:, 0:H]
        f_g = sig[:, H:2 * H]
        g_g = 2.0 * sig[:, 2 * H:3 * H] - 1.0
        o_g = sig[:, 3 * H:4 * H]
        c_new = f_g * c + i_g * g_g
        h_new = o_g * jnp.tanh(c_new)
        hs_sc[pl.ds(t, 1), :] = h_new
        return (h_new, c_new)

    lax.fori_loop(0, S, step, (h0, c0), unroll=True)

    # ---- hidden2tag + LogSoftmax (batched over all timesteps) -------------
    logits = (jnp.dot(hs_sc[...], wout_ref[...],
                      preferred_element_type=jnp.float32)
              + bout_ref[...])                                   # (S, T)
    m = jnp.max(logits, axis=-1, keepdims=True)
    z = logits - m
    lse = jnp.log(jnp.sum(jnp.exp(z), axis=-1, keepdims=True))
    out_ref[...] = z - lse


def lstm_classifier(x, w_ih, w_hh, b_ih, b_hh, w_out, b_out):
    """x: (S, D_in) float32. Returns (target_dim, S) log-softmax scores."""
    S, D = x.shape
    H = w_hh.shape[1]
    T = w_out.shape[0]

    wih_t = jnp.asarray(w_ih, jnp.float32).T                     # (D, 4H)
    whh_t = jnp.asarray(w_hh, jnp.float32).T                     # (H, 4H)
    b = (jnp.asarray(b_ih, jnp.float32)
         + jnp.asarray(b_hh, jnp.float32)).reshape(1, 4 * H)     # (1, 4H)

    # Pre-scale the g-gate (cell candidate) columns by 2 so the kernel can use a
    # single full-vreg sigmoid and recover tanh via 2*sigmoid(2x) - 1 (exact identity).
    gate_scale = jnp.concatenate([
        jnp.ones((2 * H,), jnp.float32),
        jnp.full((H,), 2.0, jnp.float32),
        jnp.ones((H,), jnp.float32),
    ]).reshape(1, 4 * H)
    wih_t = wih_t * gate_scale
    whh_t = whh_t * gate_scale
    b = b * gate_scale

    wout_t = jnp.asarray(w_out, jnp.float32).T                   # (H, T)
    bout = jnp.asarray(b_out, jnp.float32).reshape(1, T)

    # TODO(synk): the module forward is unbatched (torch.t requires 2-D); if many
    # sequences must be classified, add a leading batch grid axis with
    # dimension_semantics=("parallel",) to use v7x's second TensorCore.
    log_probs = pl.pallas_call(
        lstm_classifier_kernel,
        out_shape=jax.ShapeDtypeStruct((S, T), jnp.float32),
        in_specs=[pl.BlockSpec(memory_space=pltpu.MemorySpace.VMEM)] * 6,
        out_specs=pl.BlockSpec(memory_space=pltpu.MemorySpace.VMEM),
        scratch_shapes=[
            pltpu.VMEM((S, 4 * H), jnp.float32),   # precomputed input projection
            pltpu.VMEM((S, H), jnp.float32),       # all hidden states
        ],
    )(x, wih_t, whh_t, b, wout_t, bout)

    # torch.t(scores): glue transpose in plain JAX.
    return log_probs.T                                           # (T, S)


def lstm_classifier_ref(x, w_ih, w_hh, b_ih, b_hh, w_out, b_out):
    """Pure-JAX reference matching PyTorch nn.LSTM + Linear + LogSoftmax + t()."""
    S, D = x.shape
    H = w_hh.shape[1]

    def step(carry, x_t):
        h, c = carry
        gates = x_t @ w_ih.T + b_ih + h @ w_hh.T + b_hh
        i = jax.nn.sigmoid(gates[0:H])
        f = jax.nn.sigmoid(gates[H:2 * H])
        g = jnp.tanh(gates[2 * H:3 * H])
        o = jax.nn.sigmoid(gates[3 * H:4 * H])
        c = f * c + i * g
        h = o * jnp.tanh(c)
        return (h, c), h

    (_, _), hs = lax.scan(step, (jnp.zeros(H), jnp.zeros(H)), x)
    logits = hs @ w_out.T + b_out
    return jax.nn.log_softmax(logits, axis=1).T


if __name__ == "__main__":
    input_dim, hidden_dim, target_dim = 16, 32, 8
    seq_len = 8

    key = jax.random.PRNGKey(0)
    ks = jax.random.split(key, 8)
    bound = 1.0 / np.sqrt(hidden_dim)  # PyTorch LSTM/Linear default init range

    x = jax.random.normal(ks[0], (seq_len, input_dim), dtype=jnp.float32)
    w_ih = jax.random.uniform(ks[1], (4 * hidden_dim, input_dim), jnp.float32, -bound, bound)
    w_hh = jax.random.uniform(ks[2], (4 * hidden_dim, hidden_dim), jnp.float32, -bound, bound)
    b_ih = jax.random.uniform(ks[3], (4 * hidden_dim,), jnp.float32, -bound, bound)
    b_hh = jax.random.uniform(ks[4], (4 * hidden_dim,), jnp.float32, -bound, bound)
    w_out = jax.random.uniform(ks[5], (target_dim, hidden_dim), jnp.float32, -bound, bound)
    b_out = jax.random.uniform(ks[6], (target_dim,), jnp.float32, -bound, bound)

    scores = lstm_classifier(x, w_ih, w_hh, b_ih, b_hh, w_out, b_out)
    scores = jax.block_until_ready(scores)

    ref = lstm_classifier_ref(x, w_ih, w_hh, b_ih, b_hh, w_out, b_out)
    assert scores.shape == (target_dim, seq_len), scores.shape
    # tanh-via-scaled-sigmoid is mathematically exact; tolerance slightly loosened
    # (1e-5 -> 2e-5) to absorb the ~1e-7/step f32 rounding difference through the
    # recurrence, as flagged in the review.
    np.testing.assert_allclose(np.asarray(scores), np.asarray(ref), rtol=2e-5, atol=2e-5)

    print("KERNEL_OK")
</pallas_src>

<mosaic_0001>
module attributes {stable_mosaic.version = 11 : i64} {
  func.func @lstm_classifier_kernel(%arg0: memref<8x16xf32, #tpu.memory_space<vmem>>, %arg1: memref<16x128xf32, #tpu.memory_space<vmem>>, %arg2: memref<32x128xf32, #tpu.memory_space<vmem>>, %arg3: memref<1x128xf32, #tpu.memory_space<vmem>>, %arg4: memref<32x8xf32, #tpu.memory_space<vmem>>, %arg5: memref<1x8xf32, #tpu.memory_space<vmem>>, %arg6: memref<8x8xf32, #tpu.memory_space<vmem>>, %arg7: memref<8x128xf32, #tpu.memory_space<vmem>>, %arg8: memref<8x32xf32, #tpu.memory_space<vmem>>) attributes {dimension_semantics = [], scalar_prefetch = 0 : i64, scratch_operands = 2 : i64, tpu.core_type = #tpu.core_type<tc>} {
    %c0 = arith.constant 0 : index
    %c0_0 = arith.constant 0 : index
    %0 = vector.load %arg0[%c0, %c0_0] : memref<8x16xf32, #tpu.memory_space<vmem>>, vector<8x16xf32>
    %c0_1 = arith.constant 0 : index
    %c0_2 = arith.constant 0 : index
    %1 = vector.load %arg1[%c0_1, %c0_2] : memref<16x128xf32, #tpu.memory_space<vmem>>, vector<16x128xf32>
    %cst = arith.constant dense<0.000000e+00> : vector<8x128xf32>
    %2 = tpu.matmul %0, %1, %cst {dimension_numbers = #tpu.dot_dimension_numbers<[1], [0], [0], [1], [0, 0, 1, 1], [], []>} : vector<8x16xf32>, vector<16x128xf32>, vector<8x128xf32> -> vector<8x128xf32>
    %c0_3 = arith.constant 0 : index
    %c0_4 = arith.constant 0 : index
    %3 = vector.load %arg3[%c0_3, %c0_4] : memref<1x128xf32, #tpu.memory_space<vmem>>, vector<1x128xf32>
    %4 = vector.broadcast %3 : vector<1x128xf32> to vector<8x128xf32>
    %5 = arith.addf %2, %4 : vector<8x128xf32>
    %c0_5 = arith.constant 0 : index
    %c0_6 = arith.constant 0 : index
    %6 = vector.load %arg7[%c0_5, %c0_6] : memref<8x128xf32, #tpu.memory_space<vmem>>, vector<8x128xf32>
    tpu.vector_store %arg7[%c0_5, %c0_6], %5 {strides = array<i32>} : memref<8x128xf32, #tpu.memory_space<vmem>>, vector<8x128xf32>,
    %c0_7 = arith.constant 0 : index
    %c0_8 = arith.constant 0 : index
    %7 = vector.load %arg2[%c0_7, %c0_8] : memref<32x128xf32, #tpu.memory_space<vmem>>, vector<32x128xf32>
    %cst_9 = arith.constant 0.000000e+00 : f32
    %8 = vector.broadcast %cst_9 : f32 to vector<1x32xf32>
    %cst_10 = arith.constant 0.000000e+00 : f32
    %9 = vector.broadcast %cst_10 : f32 to vector<1x32xf32>
    %c0_i32 = arith.constant 0 : i32
    %10 = arith.index_cast %c0_i32 : i32 to index
    %c0_11 = arith.constant 0 : index
    %11 = vector.load %arg7[%10, %c0_11] : memref<8x128xf32, #tpu.memory_space<vmem>>, vector<1x128xf32>
    %cst_12 = arith.constant dense<0.000000e+00> : vector<1x128xf32>
    %12 = tpu.matmul %8, %7, %cst_12 {dimension_numbers = #tpu.dot_dimension_numbers<[1], [0], [0], [1], [0, 0, 1, 1], [], []>} : vector<1x32xf32>, vector<32x128xf32>, vector<1x128xf32> -> vector<1x128xf32>
    %13 = arith.addf %11, %12 : vector<1x128xf32>
    %14 = arith.negf %13 : vector<1x128xf32>
    %15 = math.exp %14 : vector<1x128xf32>
    %cst_13 = arith.constant 1.000000e+00 : f32
    %16 = vector.broadcast %cst_13 : f32 to vector<1x128xf32>
    %17 = arith.addf %16, %15 : vector<1x128xf32>
    %18 = arith.divf %16, %17 : vector<1x128xf32>
    %19 = vector.extract_strided_slice %18 {offsets = [0, 0], sizes = [1, 32], strides = [1, 1]} : vector<1x128xf32> to vector<1x32xf32>
    %20 = vector.extract_strided_slice %18 {offsets = [0, 32], sizes = [1, 32], strides = [1, 1]} : vector<1x128xf32> to vector<1x32xf32>
    %21 = vector.extract_strided_slice %18 {offsets = [0, 64], sizes = [1, 32], strides = [1, 1]} : vector<1x128xf32> to vector<1x32xf32>
    %cst_14 = arith.constant 2.000000e+00 : f32
    %22 = vector.broadcast %cst_14 : f32 to vector<1x32xf32>
    %23 = arith.mulf %22, %21 : vector<1x32xf32>
    %cst_15 = arith.constant 1.000000e+00 : f32
    %24 = vector.broadcast %cst_15 : f32 to vector<1x32xf32>
    %25 = arith.subf %23, %24 : vector<1x32xf32>
    %26 = vector.extract_strided_slice %18 {offsets = [0, 96], sizes = [1, 32], strides = [1, 1]} : vector<1x128xf32> to vector<1x32xf32>
    %27 = arith.mulf %20, %9 : vector<1x32xf32>
    %28 = arith.mulf %19, %25 : vector<1x32xf32>
    %29 = arith.addf %27, %28 : vector<1x32xf32>
    %30 = math.tanh %29 : vector<1x32xf32>
    %31 = arith.mulf %26, %30 : vector<1x32xf32>
    %32 = arith.index_cast %c0_i32 : i32 to index
    %c0_16 = arith.constant 0 : index
    %33 = vector.load %arg8[%32, %c0_16] : memref<8x32xf32, #tpu.memory_space<vmem>>, vector<1x32xf32>
    tpu.vector_store %arg8[%32, %c0_16], %31 {strides = array<i32>} : memref<8x32xf32, #tpu.memory_space<vmem>>, vector<1x32xf32>,
    %c1_i32 = arith.constant 1 : i32
    %34 = arith.index_cast %c1_i32 : i32 to index
    %c0_17 = arith.constant 0 : index
    %35 = vector.load %arg7[%34, %c0_17] : memref<8x128xf32, #tpu.memory_space<vmem>>, vector<1x128xf32>
    %cst_18 = arith.constant dense<0.000000e+00> : vector<1x128xf32>
    %36 = tpu.matmul %31, %7, %cst_18 {dimension_numbers = #tpu.dot_dimension_numbers<[1], [0], [0], [1], [0, 0, 1, 1], [], []>} : vector<1x32xf32>, vector<32x128xf32>, vector<1x128xf32> -> vector<1x128xf32>
    %37 = arith.addf %35, %36 : vector<1x128xf32>
    %38 = arith.negf %37 : vector<1x128xf32>
    %39 = math.exp %38 : vector<1x128xf32>
    %cst_19 = arith.constant 1.000000e+00 : f32
    %40 = vector.broadcast %cst_19 : f32 to vector<1x128xf32>
    %41 = arith.addf %40, %39 : vector<1x128xf32>
    %42 = arith.divf %40, %41 : vector<1x128xf32>
    %43 = vector.extract_strided_slice %42 {offsets = [0, 0], sizes = [1, 32], strides = [1, 1]} : vector<1x128xf32> to vector<1x32xf32>
    %44 = vector.extract_strided_slice %42 {offsets = [0, 32], sizes = [1, 32], strides = [1, 1]} : vector<1x128xf32> to vector<1x32xf32>
    %45 = vector.extract_strided_slice %42 {offsets = [0, 64], sizes = [1, 32], strides = [1, 1]} : vector<1x128xf32> to vector<1x32xf32>
    %cst_20 = arith.constant 2.000000e+00 : f32
    %46 = vector.broadcast %cst_20 : f32 to vector<1x32xf32>
    %47 = arith.mulf %46, %45 : vector<1x32xf32>
    %cst_21 = arith.constant 1.000000e+00 : f32
    %48 = vector.broadcast %cst_21 : f32 to vector<1x32xf32>
    %49 = arith.subf %47, %48 : vector<1x32xf32>
    %50 = vector.extract_strided_slice %42 {offsets = [0, 96], sizes = [1, 32], strides = [1, 1]} : vector<1x128xf32> to vector<1x32xf32>
    %51 = arith.mulf %44, %29 : vector<1x32xf32>
    %52 = arith.mulf %43, %49 : vector<1x32xf32>
    %53 = arith.addf %51, %52 : vector<1x32xf32>
    %54 = math.tanh %53 : vector<1x32xf32>
    %55 = arith.mulf %50, %54 : vector<1x32xf32>
    %56 = arith.index_cast %c1_i32 : i32 to index
    %c0_22 = arith.constant 0 : index
    %57 = vector.load %arg8[%56, %c0_22] : memref<8x32xf32, #tpu.memory_space<vmem>>, vector<1x32xf32>
    tpu.vector_store %arg8[%56, %c0_22], %55 {strides = array<i32>} : memref<8x32xf32, #tpu.memory_space<vmem>>, vector<1x32xf32>,
    %c2_i32 = arith.constant 2 : i32
    %58 = arith.index_cast %c2_i32 : i32 to index
    %c0_23 = arith.constant 0 : index
    %59 = vector.load %arg7[%58, %c0_23] : memref<8x128xf32, #tpu.memory_space<vmem>>, vector<1x128xf32>
    %cst_24 = arith.constant dense<0.000000e+00> : vector<1x128xf32>
    %60 = tpu.matmul %55, %7, %cst_24 {dimension_numbers = #tpu.dot_dimension_numbers<[1], [0], [0], [1], [0, 0, 1, 1], [], []>} : vector<1x32xf32>, vector<32x128xf32>, vector<1x128xf32> -> vector<1x128xf32>
    %61 = arith.addf %59, %60 : vector<1x128xf32>
    %62 = arith.negf %61 : vector<1x128xf32>
    %63 = math.exp %62 : vector<1x128xf32>
    %cst_25 = arith.constant 1.000000e+00 : f32
    %64 = vector.broadcast %cst_25 : f32 to vector<1x128xf32>
    %65 = arith.addf %64, %63 : vector<1x128xf32>
    %66 = arith.divf %64, %65 : vector<1x128xf32>
    %67 = vector.extract_strided_slice %66 {offsets = [0, 0], sizes = [1, 32], strides = [1, 1]} : vector<1x128xf32> to vector<1x32xf32>
    %68 = vector.extract_strided_slice %66 {offsets = [0, 32], sizes = [1, 32], strides = [1, 1]} : vector<1x128xf32> to vector<1x32xf32>
    %69 = vector.extract_strided_slice %66 {offsets = [0, 64], sizes = [1, 32], strides = [1, 1]} : vector<1x128xf32> to vector<1x32xf32>
    %cst_26 = arith.constant 2.000000e+00 : f32
    %70 = vector.broadcast %cst_26 : f32 to vector<1x32xf32>
    %71 = arith.mulf %70, %69 : vector<1x32xf32>
    %cst_27 = arith.constant 1.000000e+00 : f32
    %72 = vector.broadcast %cst_27 : f32 to vector<1x32xf32>
    %73 = arith.subf %71, %72 : vector<1x32xf32>
    %74 = vector.extract_strided_slice %66 {offsets = [0, 96], sizes = [1, 32], strides = [1, 1]} : vector<1x128xf32> to vector<1x32xf32>
    %75 = arith.mulf %68, %53 : vector<1x32xf32>
    %76 = arith.mulf %67, %73 : vector<1x32xf32>
    %77 = arith.addf %75, %76 : vector<1x32xf32>
    %78 = math.tanh %77 : vector<1x32xf32>
    %79 = arith.mulf %74, %78 : vector<1x32xf32>
    %80 = arith.index_cast %c2_i32 : i32 to index
    %c0_28 = arith.constant 0 : index
    %81 = vector.load %arg8[%80, %c0_28] : memref<8x32xf32, #tpu.memory_space<vmem>>, vector<1x32xf32>
    tpu.vector_store %arg8[%80, %c0_28], %79 {strides = array<i32>} : memref<8x32xf32, #tpu.memory_space<vmem>>, vector<1x32xf32>,
    %c3_i32 = arith.constant 3 : i32
    %82 = arith.index_cast %c3_i32 : i32 to index
    %c0_29 = arith.constant 0 : index
    %83 = vector.load %arg7[%82, %c0_29] : memref<8x128xf32, #tpu.memory_space<vmem>>, vector<1x128xf32>
    %cst_30 = arith.constant dense<0.000000e+00> : vector<1x128xf32>
    %84 = tpu.matmul %79, %7, %cst_30 {dimension_numbers = #tpu.dot_dimension_numbers<[1], [0], [0], [1], [0, 0, 1, 1], [], []>} : vector<1x32xf32>, vector<32x128xf32>, vector<1x128xf32> -> vector<1x128xf32>
    %85 = arith.addf %83, %84 : vector<1x128xf32>
    %86 = arith.negf %85 : vector<1x128xf32>
    %87 = math.exp %86 : vector<1x128xf32>
    %cst_31 = arith.constant 1.000000e+00 : f32
    %88 = vector.broadcast %cst_31 : f32 to vector<1x128xf32>
    %89 = arith.addf %88, %87 : vector<1x128xf32>
    %90 = arith.divf %88, %89 : vector<1x128xf32>
    %91 = vector.extract_strided_slice %90 {offsets = [0, 0], sizes = [1, 32], strides = [1, 1]} : vector<1x128xf32> to vector<1x32xf32>
    %92 = vector.extract_strided_slice %90 {offsets = [0, 32], sizes = [1, 32], strides = [1, 1]} : vector<1x128xf32> to vector<1x32xf32>
    %93 = vector.extract_strided_slice %90 {offsets = [0, 64], sizes = [1, 32], strides = [1, 1]} : vector<1x128xf32> to vector<1x32xf32>
    %cst_32 = arith.constant 2.000000e+00 : f32
    %94 = vector.broadcast %cst_32 : f32 to vector<1x32xf32>
    %95 = arith.mulf %94, %93 : vector<1x32xf32>
    %cst_33 = arith.constant 1.000000e+00 : f32
    %96 = vector.broadcast %cst_33 : f32 to vector<1x32xf32>
    %97 = arith.subf %95, %96 : vector<1x32xf32>
    %98 = vector.extract_strided_slice %90 {offsets = [0, 96], sizes = [1, 32], strides = [1, 1]} : vector<1x128xf32> to vector<1x32xf32>
    %99 = arith.mulf %92, %77 : vector<1x32xf32>
    %100 = arith.mulf %91, %97 : vector<1x32xf32>
    %101 = arith.addf %99, %100 : vector<1x32xf32>
    %102 = math.tanh %101 : vector<1x32xf32>
    %103 = arith.mulf %98, %102 : vector<1x32xf32>
    %104 = arith.index_cast %c3_i32 : i32 to index
    %c0_34 = arith.constant 0 : index
    %105 = vector.load %arg8[%104, %c0_34] : memref<8x32xf32, #tpu.memory_space<vmem>>, vector<1x32xf32>
    tpu.vector_store %arg8[%104, %c0_34], %103 {strides = array<i32>} : memref<8x32xf32, #tpu.memory_space<vmem>>, vector<1x32xf32>,
    %c4_i32 = arith.constant 4 : i32
    %106 = arith.index_cast %c4_i32 : i32 to index
    %c0_35 = arith.constant 0 : index
    %107 = vector.load %arg7[%106, %c0_35] : memref<8x128xf32, #tpu.memory_space<vmem>>, vector<1x128xf32>
    %cst_36 = arith.constant dense<0.000000e+00> : vector<1x128xf32>
    %108 = tpu.matmul %103, %7, %cst_36 {dimension_numbers = #tpu.dot_dimension_numbers<[1], [0], [0], [1], [0, 0, 1, 1], [], []>} : vector<1x32xf32>, vector<32x128xf32>, vector<1x128xf32> -> vector<1x128xf32>
    %109 = arith.addf %107, %108 : vector<1x128xf32>
    %110 = arith.negf %109 : vector<1x128xf32>
    %111 = math.exp %110 : vector<1x128xf32>
    %cst_37 = arith.constant 1.000000e+00 : f32
    %112 = vector.broadcast %cst_37 : f32 to vector<1x128xf32>
    %113 = arith.addf %112, %111 : vector<1x128xf32>
    %114 = arith.divf %112, %113 : vector<1x128xf32>
    %115 = vector.extract_strided_slice %114 {offsets = [0, 0], sizes = [1, 32], strides = [1, 1]} : vector<1x128xf32> to vector<1x32xf32>
    %116 = vector.extract_strided_slice %114 {offsets = [0, 32], sizes = [1, 32], strides = [1, 1]} : vector<1x128xf32> to vector<1x32xf32>
    %117 = vector.extract_strided_slice %114 {offsets = [0, 64], sizes = [1, 32], strides = [1, 1]} : vector<1x128xf32> to vector<1x32xf32>
    %cst_38 = arith.constant 2.000000e+00 : f32
    %118 = vector.broadcast %cst_38 : f32 to vector<1x32xf32>
    %119 = arith.mulf %118, %117 : vector<1x32xf32>
    %cst_39 = arith.constant 1.000000e+00 : f32
    %120 = vector.broadcast %cst_39 : f32 to vector<1x32xf32>
    %121 = arith.subf %119, %120 : vector<1x32xf32>
    %122 = vector.extract_strided_slice %114 {offsets = [0, 96], sizes = [1, 32], strides = [1, 1]} : vector<1x128xf32> to vector<1x32xf32>
    %123 = arith.mulf %116, %101 : vector<1x32xf32>
    %124 = arith.mulf %115, %121 : vector<1x32xf32>
    %125 = arith.addf %123, %124 : vector<1x32xf32>
    %126 = math.tanh %125 : vector<1x32xf32>
    %127 = arith.mulf %122, %126 : vector<1x32xf32>
    %128 = arith.index_cast %c4_i32 : i32 to index
    %c0_40 = arith.constant 0 : index
    %129 = vector.load %arg8[%128, %c0_40] : memref<8x32xf32, #tpu.memory_space<vmem>>, vector<1x32xf32>
    tpu.vector_store %arg8[%128, %c0_40], %127 {strides = array<i32>} : memref<8x32xf32, #tpu.memory_space<vmem>>, vector<1x32xf32>,
    %c5_i32 = arith.constant 5 : i32
    %130 = arith.index_cast %c5_i32 : i32 to index
    %c0_41 = arith.constant 0 : index
    %131 = vector.load %arg7[%130, %c0_41] : memref<8x128xf32, #tpu.memory_space<vmem>>, vector<1x128xf32>
    %cst_42 = arith.constant dense<0.000000e+00> : vector<1x128xf32>
    %132 = tpu.matmul %127, %7, %cst_42 {dimension_numbers = #tpu.dot_dimension_numbers<[1], [0], [0], [1], [0, 0, 1, 1], [], []>} : vector<1x32xf32>, vector<32x128xf32>, vector<1x128xf32> -> vector<1x128xf32>
    %133 = arith.addf %131, %132 : vector<1x128xf32>
    %134 = arith.negf %133 : vector<1x128xf32>
    %135 = math.exp %134 : vector<1x128xf32>
    %cst_43 = arith.constant 1.000000e+00 : f32
    %136 = vector.broadcast %cst_43 : f32 to vector<1x128xf32>
    %137 = arith.addf %136, %135 : vector<1x128xf32>
    %138 = arith.divf %136, %137 : vector<1x128xf32>
    %139 = vector.extract_strided_slice %138 {offsets = [0, 0], sizes = [1, 32], strides = [1, 1]} : vector<1x128xf32> to vector<1x32xf32>
    %140 = vector.extract_strided_slice %138 {offsets = [0, 32], sizes = [1, 32], strides = [1, 1]} : vector<1x128xf32> to vector<1x32xf32>
    %141 = vector.extract_strided_slice %138 {offsets = [0, 64], sizes = [1, 32], strides = [1, 1]} : vector<1x128xf32> to vector<1x32xf32>
    %cst_44 = arith.constant 2.000000e+00 : f32
    %142 = vector.broadcast %cst_44 : f32 to vector<1x32xf32>
    %143 = arith.mulf %142, %141 : vector<1x32xf32>
    %cst_45 = arith.constant 1.000000e+00 : f32
    %144 = vector.broadcast %cst_45 : f32 to vector<1x32xf32>
    %145 = arith.subf %143, %144 : vector<1x32xf32>
    %146 = vector.extract_strided_slice %138 {offsets = [0, 96], sizes = [1, 32], strides = [1, 1]} : vector<1x128xf32> to vector<1x32xf32>
    %147 = arith.mulf %140, %125 : vector<1x32xf32>
    %148 = arith.mulf %139, %145 : vector<1x32xf32>
    %149 = arith.addf %147, %148 : vector<1x32xf32>
    %150 = math.tanh %149 : vector<1x32xf32>
    %151 = arith.mulf %146, %150 : vector<1x32xf32>
    %152 = arith.index_cast %c5_i32 : i32 to index
    %c0_46 = arith.constant 0 : index
    %153 = vector.load %arg8[%152, %c0_46] : memref<8x32xf32, #tpu.memory_space<vmem>>, vector<1x32xf32>
    tpu.vector_store %arg8[%152, %c0_46], %151 {strides = array<i32>} : memref<8x32xf32, #tpu.memory_space<vmem>>, vector<1x32xf32>,
    %c6_i32 = arith.constant 6 : i32
    %154 = arith.index_cast %c6_i32 : i32 to index
    %c0_47 = arith.constant 0 : index
    %155 = vector.load %arg7[%154, %c0_47] : memref<8x128xf32, #tpu.memory_space<vmem>>, vector<1x128xf32>
    %cst_48 = arith.constant dense<0.000000e+00> : vector<1x128xf32>
    %156 = tpu.matmul %151, %7, %cst_48 {dimension_numbers = #tpu.dot_dimension_numbers<[1], [0], [0], [1], [0, 0, 1, 1], [], []>} : vector<1x32xf32>, vector<32x128xf32>, vector<1x128xf32> -> vector<1x128xf32>
    %157 = arith.addf %155, %156 : vector<1x128xf32>
    %158 = arith.negf %157 : vector<1x128xf32>
    %159 = math.exp %158 : vector<1x128xf32>
    %cst_49 = arith.constant 1.000000e+00 : f32
    %160 = vector.broadcast %cst_49 : f32 to vector<1x128xf32>
    %161 = arith.addf %160, %159 : vector<1x128xf32>
    %162 = arith.divf %160, %161 : vector<1x128xf32>
    %163 = vector.extract_strided_slice %162 {offsets = [0, 0], sizes = [1, 32], strides = [1, 1]} : vector<1x128xf32> to vector<1x32xf32>
    %164 = vector.extract_strided_slice %162 {offsets = [0, 32], sizes = [1, 32], strides = [1, 1]} : vector<1x128xf32> to vector<1x32xf32>
    %165 = vector.extract_strided_slice %162 {offsets = [0, 64], sizes = [1, 32], strides = [1, 1]} : vector<1x128xf32> to vector<1x32xf32>
    %cst_50 = arith.constant 2.000000e+00 : f32
    %166 = vector.broadcast %cst_50 : f32 to vector<1x32xf32>
    %167 = arith.mulf %166, %165 : vector<1x32xf32>
    %cst_51 = arith.constant 1.000000e+00 : f32
    %168 = vector.broadcast %cst_51 : f32 to vector<1x32xf32>
    %169 = arith.subf %167, %168 : vector<1x32xf32>
    %170 = vector.extract_strided_slice %162 {offsets = [0, 96], sizes = [1, 32], strides = [1, 1]} : vector<1x128xf32> to vector<1x32xf32>
    %171 = arith.mulf %164, %149 : vector<1x32xf32>
    %172 = arith.mulf %163, %169 : vector<1x32xf32>
    %173 = arith.addf %171, %172 : vector<1x32xf32>
    %174 = math.tanh %173 : vector<1x32xf32>
    %175 = arith.mulf %170, %174 : vector<1x32xf32>
    %176 = arith.index_cast %c6_i32 : i32 to index
    %c0_52 = arith.constant 0 : index
    %177 = vector.load %arg8[%176, %c0_52] : memref<8x32xf32, #tpu.memory_space<vmem>>, vector<1x32xf32>
    tpu.vector_store %arg8[%176, %c0_52], %175 {strides = array<i32>} : memref<8x32xf32, #tpu.memory_space<vmem>>, vector<1x32xf32>,
    %c7_i32 = arith.constant 7 : i32
    %178 = arith.index_cast %c7_i32 : i32 to index
    %c0_53 = arith.constant 0 : index
    %179 = vector.load %arg7[%178, %c0_53] : memref<8x128xf32, #tpu.memory_space<vmem>>, vector<1x128xf32>
    %cst_54 = arith.constant dense<0.000000e+00> : vector<1x128xf32>
    %180 = tpu.matmul %175, %7, %cst_54 {dimension_numbers = #tpu.dot_dimension_numbers<[1], [0], [0], [1], [0, 0, 1, 1], [], []>} : vector<1x32xf32>, vector<32x128xf32>, vector<1x128xf32> -> vector<1x128xf32>
    %181 = arith.addf %179, %180 : vector<1x128xf32>
    %182 = arith.negf %181 : vector<1x128xf32>
    %183 = math.exp %182 : vector<1x128xf32>
    %cst_55 = arith.constant 1.000000e+00 : f32
    %184 = vector.broadcast %cst_55 : f32 to vector<1x128xf32>
    %185 = arith.addf %184, %183 : vector<1x128xf32>
    %186 = arith.divf %184, %185 : vector<1x128xf32>
    %187 = vector.extract_strided_slice %186 {offsets = [0, 0], sizes = [1, 32], strides = [1, 1]} : vector<1x128xf32> to vector<1x32xf32>
    %188 = vector.extract_strided_slice %186 {offsets = [0, 32], sizes = [1, 32], strides = [1, 1]} : vector<1x128xf32> to vector<1x32xf32>
    %189 = vector.extract_strided_slice %186 {offsets = [0, 64], sizes = [1, 32], strides = [1, 1]} : vector<1x128xf32> to vector<1x32xf32>
    %cst_56 = arith.constant 2.000000e+00 : f32
    %190 = vector.broadcast %cst_56 : f32 to vector<1x32xf32>
    %191 = arith.mulf %190, %189 : vector<1x32xf32>
    %cst_57 = arith.constant 1.000000e+00 : f32
    %192 = vector.broadcast %cst_57 : f32 to vector<1x32xf32>
    %193 = arith.subf %191, %192 : vector<1x32xf32>
    %194 = vector.extract_strided_slice %186 {offsets = [0, 96], sizes = [1, 32], strides = [1, 1]} : vector<1x128xf32> to vector<1x32xf32>
    %195 = arith.mulf %188, %173 : vector<1x32xf32>
    %196 = arith.mulf %187, %193 : vector<1x32xf32>
    %197 = arith.addf %195, %196 : vector<1x32xf32>
    %198 = math.tanh %197 : vector<1x32xf32>
    %199 = arith.mulf %194, %198 : vector<1x32xf32>
    %200 = arith.index_cast %c7_i32 : i32 to index
    %c0_58 = arith.constant 0 : index
    %201 = vector.load %arg8[%200, %c0_58] : memref<8x32xf32, #tpu.memory_space<vmem>>, vector<1x32xf32>
    tpu.vector_store %arg8[%200, %c0_58], %199 {strides = array<i32>} : memref<8x32xf32, #tpu.memory_space<vmem>>, vector<1x32xf32>,
    %c8_i32 = arith.constant 8 : i32
    %c0_59 = arith.constant 0 : index
    %c0_60 = arith.constant 0 : index
    %202 = vector.load %arg8[%c0_59, %c0_60] : memref<8x32xf32, #tpu.memory_space<vmem>>, vector<8x32xf32>
    %c0_61 = arith.constant 0 : index
    %c0_62 = arith.constant 0 : index
    %203 = vector.load %arg4[%c0_61, %c0_62] : memref<32x8xf32, #tpu.memory_space<vmem>>, vector<32x8xf32>
    %cst_63 = arith.constant dense<0.000000e+00> : vector<8x8xf32>
    %204 = tpu.matmul %202, %203, %cst_63 {dimension_numbers = #tpu.dot_dimension_numbers<[1], [0], [0], [1], [0, 0, 1, 1], [], []>} : vector<8x32xf32>, vector<32x8xf32>, vector<8x8xf32> -> vector<8x8xf32>
    %c0_64 = arith.constant 0 : index
    %c0_65 = arith.constant 0 : index
    %205 = vector.load %arg5[%c0_64, %c0_65] : memref<1x8xf32, #tpu.memory_space<vmem>>, vector<1x8xf32>
    %206 = vector.broadcast %205 : vector<1x8xf32> to vector<8x8xf32>
    %207 = arith.addf %204, %206 : vector<8x8xf32>
    %cst_66 = arith.constant dense<0xFF800000> : vector<8xf32>
    %208 = vector.multi_reduction <maximumf>, %207, %cst_66 [1] : vector<8x8xf32> to vector<8xf32>
    %209 = vector.shape_cast %208 : vector<8xf32> to vector<8x1xf32>
    %210 = vector.broadcast %209 : vector<8x1xf32> to vector<8x8xf32>
    %211 = arith.subf %207, %210 : vector<8x8xf32>
    %212 = math.exp %211 : vector<8x8xf32>
    %cst_67 = arith.constant dense<0.000000e+00> : vector<8xf32>
    %213 = vector.multi_reduction <add>, %212, %cst_67 [1] : vector<8x8xf32> to vector<8xf32>
    %214 = vector.shape_cast %213 : vector<8xf32> to vector<8x1xf32>
    %215 = math.log %214 : vector<8x1xf32>
    %216 = vector.broadcast %215 : vector<8x1xf32> to vector<8x8xf32>
    %217 = arith.subf %211, %216 : vector<8x8xf32>
    %c0_68 = arith.constant 0 : index
    %c0_69 = arith.constant 0 : index
    %218 = vector.load %arg6[%c0_68, %c0_69] : memref<8x8xf32, #tpu.memory_space<vmem>>, vector<8x8xf32>
    tpu.vector_store %arg6[%c0_68, %c0_69], %217 {strides = array<i32>} : memref<8x8xf32, #tpu.memory_space<vmem>>, vector<8x8xf32>,
    return
  }
}

</mosaic_0001>

<bundles_post_ra>
// kernel: tpu_custom_call.1
= control target key start
LH: loop header
LB: loop body
LE: loop exit
PB: predicated region body
PF: predicated region fallthrough
CT: control target
= control target key end

     0   :  { %11 = vsyncpa [#allocation5], 0  ;;  %s948_s0 = inlined_call_operand.vmem [shape: f32[8,16], index: 0, kind: input, shape index: {}]   ;;  %s949_s1 = inlined_call_operand.hbm [shape: f32[16,128], index: 1, kind: input, shape index: {}]   ;;  %s950_s2 = inlined_call_operand.vmem [shape: f32[32,128], index: 2, kind: input, shape index: {}]   ;;  %s951_s3 = inlined_call_operand.vmem [shape: f32[1,128], index: 3, kind: input, shape index: {}]   ;;  %s952_s4 = inlined_call_operand.vmem [shape: f32[32,8], index: 4, kind: input, shape index: {}]   ;;  %s953_s5 = inlined_call_operand.vmem [shape: f32[1,8], index: 5, kind: input, shape index: {}]   ;;  %s954_s6 = inlined_call_operand.hbm [shape: f32[8,8], index: 6, kind: output, shape index: {}]  }
   0x1   :  { %12 = vsyncpa [#allocation6], 0  ;;  %s19_s23 = sshll.u32 %s949_s1, 4  ;;  %s816_s24 = smov [#allocation4]   ;;  %s20_s23 = int_to_ptr.hbm [resolvable:$true] %s19_s23 }
   0x2   :  { %s21_s25 = sshll.u32 %s816_s24, 4  ;;  %s817_s26 = smov 128   ;;  %s22_s25 = int_to_ptr.vmem [resolvable:$true] %s21_s25 }
   0x3   :  { %s818_s27 = smov 8  }
   0x4   :  { %27 = dma.hbm_to_vmem [thread:$0]  %s20_s23, 256, %s22_s25, [#allocation5], %s817_s26, %s817_s26, %s818_s27  }
   0x5   :  { %812 = dma.done.wait [#allocation5], 256  }
   0x6   :  { %813 = vsyncadd [#allocation5], 4294967040  ;;  %v42_v0 = vld [vmem:[#allocation4 + $0x8] sm:$0xff]  ;;  %v41_v1 = vld [vmem:[#allocation4] sm:$0xff]  ;;  %vm47_vm0 = vcmask 130048   ;;  %v819_v7 = vmov 0.0  }
   0x7   :  { %65 = vmatpush.msra.mxu0 %v42_v0  ;;  %v40_v2 = vld [vmem:[%s948_s0] sm:$0xff]  ;;  %v75_v3 = vld [vmem:[%s950_s2 + $0x18] sm:$0xff]  ;;  %v74_v4 = vld [vmem:[%s950_s2 + $0x10] sm:$0xff]  ;;  %s821_s13 = smov 32   ;;  %vm144_vm5 = vcmask 253952   ;;  %vm77_vm6 = vcmask 261120  }
   0x8   :  { %93 = vmatpush.msra.mxu1 %v75_v3  ;;  %161 = vmatpush.msra.mxu2 %v75_v3  ;;  %v73_v5 = vld [vmem:[%s950_s2 + $0x8] sm:$0xff]  ;;  %v72_v6 = vld [vmem:[%s950_s2] sm:$0xff]  ;;  %s668_s26 = sshll.u32 %s954_s6, 4  ;;  %s669_s26 = int_to_ptr.hbm [resolvable:$true] %s668_s26 }
   0x9   :  { %66 = vmatpush.msra.mxu0 %v41_v1  ;;  %228 = vmatpush.msra.mxu3 %v75_v3  ;;  %v710_v8 = vld [vmem:[%s951_s3] ss:$0 sm:$0xff]  ;;  %s820_s3 = smov 64  }
   0xa   :  { %678 = vmatmul.msk.f32.vlgmr.msra.gmra.mxu0 %vm47_vm0, %v40_v2  ;;  %94 = vmatpush.msra.mxu1 %v74_v4 }
   0xb   :  { %162 = vmatpush.msra.mxu2 %v74_v4  ;;  %229 = vmatpush.msra.mxu3 %v74_v4 }
   0xc   :  { %95 = vmatpush.msra.mxu1 %v73_v5  ;;  %295 = vmatpush.msrb.mxu0 %v75_v3 }
   0xd   :  { %163 = vmatpush.msra.mxu2 %v73_v5  ;;  %230 = vmatpush.msra.mxu3 %v73_v5 }
   0xe   :  { %96 = vmatpush.msra.mxu1 %v72_v6  ;;  %296 = vmatpush.msrb.mxu0 %v74_v4 }
   0xf   :  { %97 = vmatmul.f32.vlgmr.msra.gmra.mxu1 %v819_v7  ;;  %164 = vmatpush.msra.mxu2 %v72_v6 }
  0x10   :  { %231 = vmatpush.msra.mxu3 %v72_v6  ;;  %297 = vmatpush.msrb.mxu0 %v73_v5 }
  0x11   :  { %362 = vmatpush.msrb.mxu1 %v75_v3  ;;  %429 = vmatpush.msrb.mxu2 %v75_v3 }
  0x12   :  { %298 = vmatpush.msrb.mxu0 %v72_v6  ;;  %496 = vmatpush.msrb.mxu3 %v75_v3 }
  0x13   :  { %363 = vmatpush.msrb.mxu1 %v74_v4  ;;  %430 = vmatpush.msrb.mxu2 %v74_v4 }
  0x14   :  { %497 = vmatpush.msrb.mxu3 %v74_v4  ;;  %563 = vmatpush.msra.mxu0 %v75_v3 }
  0x15   :  { %364 = vmatpush.msrb.mxu1 %v73_v5  ;;  %431 = vmatpush.msrb.mxu2 %v73_v5 }
  0x16   :  { %498 = vmatpush.msrb.mxu3 %v73_v5  ;;  %564 = vmatpush.msra.mxu0 %v74_v4 }
  0x17   :  { %365 = vmatpush.msrb.mxu1 %v72_v6  ;;  %432 = vmatpush.msrb.mxu2 %v72_v6 }
  0x18   :  { %499 = vmatpush.msrb.mxu3 %v72_v6  ;;  %565 = vmatpush.msra.mxu0 %v73_v5 }
  0x1a   :  { %566 = vmatpush.msra.mxu0 %v72_v6 }
  0x87   :  { %v68_v9 = vpop.f32.mrf.mxu0 }
  0x88   :  { %v69_v10 = vadd.f32 %v710_v8, %v68_v9 }
  0x8a   :  { %71 = vst [vmem:[#allocation2] sm:$0xff] %v69_v10 }
  0x8c   :  { %v98_v11 = vpop.f32.mrf.mxu1 }
  0x91   :  { %v76_v12 = vld [vmem:[#allocation2] sm:$0x1]  ;;  %v146_v38 = vld [vmem:[#allocation2 + $0x1] sm:$0x1]  ;;  %v213_v1 = vld [vmem:[#allocation2 + $0x2] sm:$0x1] }
  0x92   :  { %v101_v13 = vadd.f32 %v98_v11, %v76_v12 }
  0x94   :  { %v679_v14 = vmul.f32 -1.442695, %v101_v13 }
  0x96   :  { %712 = vpow2.f32 %v679_v14 }
  0x9c   :  { %v713_v15 = vpop.eup %712 }
  0x9d   :  { %v105_v16 = vadd.f32 1.0, %v713_v15 }
  0x9f   :  { %714 = vrcp.f32 %v105_v16  ;;  %v117_v20 = vand.u32 2147483648, %v105_v16  ;;  %v115_v22 = vand.u32 2147483647, %v105_v16  ;;  %vm111_vm2 = vweird.f32 %v105_v16 }
  0xa1   :  { %v118_v24 = vor.u32 1.1754944e-38, %v117_v20  ;;  %vm116_vm4 = vcmp.eq.f32.partialorder %v115_v22, 8.507059e+37 }
  0xa5   :  { %v715_v17 = vpop.eup %714 }
  0xa6   :  { %v107_v18 = vmul.f32 %v715_v17, %v105_v16  ;;  %vm112_vm1 = vweird.f32 %v715_v17 }
  0xa7   :  { %vm113_vm3 = vmor %vm111_vm2, %vm112_vm1 }
  0xa8   :  { %v108_v19 = vsub.f32 1.0, %v107_v18 }
  0xaa   :  { %v109_v21 = vmul.f32 %v715_v17, %v108_v19 }
  0xac   :  { %v110_v23 = vadd.f32 %v715_v17, %v109_v21 }
  0xae   :  { %v114_v25 = vsel %vm113_vm3, %v715_v17, %v110_v23 }
  0xaf   :  { %v119_v26 = vsel %vm116_vm4, %v118_v24, %v114_v25 }
  0xb0   :  { %v121_v27 = vmul.f32 2.0, %v119_v26  ;;  %v123_v31 = vmul.f32 0.0, %v119_v26 }
  0xb2   :  { %v680_v28 = vadd.f32 -1.0, %v121_v27 }
  0xb4   :  { %125 = vrot.lane.b32.xlu0 %v680_v28, %s820_s3  ;;  %v280_v28 = vld [vmem:[#allocation2 + $0x3] sm:$0x1] }
 0x126   :  { %v126_v29 = vpop.permute.xlu0 %125 }
 0x127   :  { %v128_v30 = vmul.f32 %v126_v29, %v119_v26 }
 0x129   :  { %130 = vrot.lane.b32.xlu0 %v128_v30, %s821_s13 }
 0x19b   :  { %v131_v32 = vpop.permute.xlu0 %130 }
 0x19c   :  { %v133_v33 = vadd.f32 %v131_v32, %v123_v31 }
 0x19e   :  { %716 = vtanh.f32 %v133_v33 }
 0x1a4   :  { %v717_v34 = vpop.eup %716 }
 0x1a5   :  { %136 = vrot.lane.b32.xlu1 %v717_v34, %s820_s3 }
 0x217   :  { %v137_v35 = vpop.permute.xlu1 %136 }
 0x218   :  { %v139_v36 = vmul.f32 %v137_v35, %v119_v26 }
 0x21a   :  { %141 = vrot.lane.b32.xlu1 %v139_v36, %s821_s13 }
 0x28c   :  { %v142_v37 = vpop.permute.xlu1 %141 }
 0x28d   :  { %145 = vst.msk [vmem:[#allocation3] sm:$0x1] %vm144_vm5, %v142_v37  ;;  %681 = vmatmul.msk.f32.vlgmr.msra.gmra.mxu2 %vm77_vm6, %v142_v37 }
 0x310   :  { %v166_v39 = vpop.f32.mrf.mxu2 }
 0x311   :  { %v169_v40 = vadd.f32 %v166_v39, %v146_v38 }
 0x313   :  { %v682_v41 = vmul.f32 -1.442695, %v169_v40 }
 0x315   :  { %718 = vpow2.f32 %v682_v41 }
 0x31b   :  { %v719_v42 = vpop.eup %718 }
 0x31c   :  { %v173_v43 = vadd.f32 1.0, %v719_v42 }
 0x31e   :  { %720 = vrcp.f32 %v173_v43  ;;  %v185_v47 = vand.u32 2147483648, %v173_v43  ;;  %v183_v49 = vand.u32 2147483647, %v173_v43  ;;  %vm179_vm8 = vweird.f32 %v173_v43 }
 0x320   :  { %v186_v51 = vor.u32 1.1754944e-38, %v185_v47  ;;  %vm184_vm10 = vcmp.eq.f32.partialorder %v183_v49, 8.507059e+37 }
 0x324   :  { %v721_v44 = vpop.eup %720 }
 0x325   :  { %v175_v45 = vmul.f32 %v721_v44, %v173_v43  ;;  %vm180_vm7 = vweird.f32 %v721_v44 }
 0x326   :  { %vm181_vm9 = vmor %vm179_vm8, %vm180_vm7 }
 0x327   :  { %v176_v46 = vsub.f32 1.0, %v175_v45 }
 0x329   :  { %v177_v48 = vmul.f32 %v721_v44, %v176_v46 }
 0x32b   :  { %v178_v50 = vadd.f32 %v721_v44, %v177_v48 }
 0x32d   :  { %v182_v52 = vsel %vm181_vm9, %v721_v44, %v178_v50 }
 0x32e   :  { %v187_v53 = vsel %vm184_vm10, %v186_v51, %v182_v52 }
 0x32f   :  { %v189_v54 = vmul.f32 2.0, %v187_v53  ;;  %v191_v58 = vmul.f32 %v187_v53, %v133_v33 }
 0x331   :  { %v683_v55 = vadd.f32 -1.0, %v189_v54 }
 0x333   :  { %193 = vrot.lane.b32.xlu2 %v683_v55, %s820_s3  ;;  %v347_v55 = vld [vmem:[#allocation2 + $0x4] sm:$0x1] }
 0x38d   :  { %v194_v56 = vpop.permute.xlu2 %193 }
 0x38e   :  { %v196_v57 = vmul.f32 %v194_v56, %v187_v53 }
 0x390   :  { %198 = vrot.lane.b32.xlu2 %v196_v57, %s821_s13 }
 0x3ea   :  { %v199_v59 = vpop.permute.xlu2 %198 }
 0x3eb   :  { %v201_v60 = vadd.f32 %v199_v59, %v191_v58 }
 0x3ed   :  { %722 = vtanh.f32 %v201_v60 }
 0x3f3   :  { %v723_v61 = vpop.eup %722 }
 0x3f4   :  { %204 = vrot.lane.b32.xlu0 %v723_v61, %s820_s3 }
 0x466   :  { %v205_v62 = vpop.permute.xlu0 %204 }
 0x467   :  { %v207_v63 = vmul.f32 %v205_v62, %v187_v53 }
 0x469   :  { %209 = vrot.lane.b32.xlu1 %v207_v63, %s821_s13 }
 0x4db   :  { %v210_v0 = vpop.permute.xlu1 %209 }
 0x4dc   :  { %212 = vst.msk [vmem:[#allocation3 + $0x1] sm:$0x1] %vm144_vm5, %v210_v0  ;;  %684 = vmatmul.msk.f32.vlgmr.msra.gmra.mxu3 %vm77_vm6, %v210_v0 }
 0x55f   :  { %v233_v2 = vpop.f32.mrf.mxu3 }
 0x560   :  { %v236_v3 = vadd.f32 %v233_v2, %v213_v1 }
 0x562   :  { %v685_v4 = vmul.f32 -1.442695, %v236_v3 }
 0x564   :  { %724 = vpow2.f32 %v685_v4 }
 0x56a   :  { %v725_v5 = vpop.eup %724 }
 0x56b   :  { %v240_v6 = vadd.f32 1.0, %v725_v5 }
 0x56d   :  { %726 = vrcp.f32 %v240_v6  ;;  %v252_v10 = vand.u32 2147483648, %v240_v6  ;;  %v250_v12 = vand.u32 2147483647, %v240_v6  ;;  %vm246_vm12 = vweird.f32 %v240_v6 }
 0x56f   :  { %v253_v14 = vor.u32 1.1754944e-38, %v252_v10  ;;  %vm251_vm14 = vcmp.eq.f32.partialorder %v250_v12, 8.507059e+37 }
 0x573   :  { %v727_v7 = vpop.eup %726 }
 0x574   :  { %v242_v8 = vmul.f32 %v727_v7, %v240_v6  ;;  %vm247_vm11 = vweird.f32 %v727_v7 }
 0x575   :  { %vm248_vm13 = vmor %vm246_vm12, %vm247_vm11 }
 0x576   :  { %v243_v9 = vsub.f32 1.0, %v242_v8 }
 0x578   :  { %v244_v11 = vmul.f32 %v727_v7, %v243_v9 }
 0x57a   :  { %v245_v13 = vadd.f32 %v727_v7, %v244_v11 }
 0x57c   :  { %v249_v15 = vsel %vm248_vm13, %v727_v7, %v245_v13 }
 0x57d   :  { %v254_v16 = vsel %vm251_vm14, %v253_v14, %v249_v15 }
 0x57e   :  { %v256_v17 = vmul.f32 2.0, %v254_v16  ;;  %v258_v21 = vmul.f32 %v254_v16, %v201_v60 }
 0x580   :  { %v686_v18 = vadd.f32 -1.0, %v256_v17 }
 0x582   :  { %260 = vrot.lane.b32.xlu2 %v686_v18, %s820_s3  ;;  %v414_v18 = vld [vmem:[#allocation2 + $0x5] sm:$0x1] }
 0x5dc   :  { %v261_v19 = vpop.permute.xlu2 %260 }
 0x5dd   :  { %v263_v20 = vmul.f32 %v261_v19, %v254_v16 }
 0x5df   :  { %265 = vrot.lane.b32.xlu0 %v263_v20, %s821_s13 }
 0x651   :  { %v266_v22 = vpop.permute.xlu0 %265 }
 0x652   :  { %v268_v23 = vadd.f32 %v266_v22, %v258_v21 }
 0x654   :  { %728 = vtanh.f32 %v268_v23 }
 0x65a   :  { %v729_v24 = vpop.eup %728 }
 0x65b   :  { %271 = vrot.lane.b32.xlu1 %v729_v24, %s820_s3 }
 0x6cd   :  { %v272_v25 = vpop.permute.xlu1 %271 }
 0x6ce   :  { %v274_v26 = vmul.f32 %v272_v25, %v254_v16 }
 0x6d0   :  { %276 = vrot.lane.b32.xlu2 %v274_v26, %s821_s13 }
 0x72a   :  { %v277_v27 = vpop.permute.xlu2 %276 }
 0x72b   :  { %279 = vst.msk [vmem:[#allocation3 + $0x2] sm:$0x1] %vm144_vm5, %v277_v27  ;;  %687 = vmatmul.msk.f32.vlgmr.msrb.gmra.mxu0 %vm77_vm6, %v277_v27 }
 0x7a8   :  { %v300_v29 = vpop.f32.mrf.mxu0 }
 0x7a9   :  { %v303_v30 = vadd.f32 %v300_v29, %v280_v28 }
 0x7ab   :  { %v688_v31 = vmul.f32 -1.442695, %v303_v30 }
 0x7ad   :  { %730 = vpow2.f32 %v688_v31 }
 0x7b3   :  { %v731_v32 = vpop.eup %730 }
 0x7b4   :  { %v307_v33 = vadd.f32 1.0, %v731_v32 }
 0x7b6   :  { %732 = vrcp.f32 %v307_v33  ;;  %v319_v37 = vand.u32 2147483648, %v307_v33  ;;  %v317_v39 = vand.u32 2147483647, %v307_v33  ;;  %vm313_vm0 = vweird.f32 %v307_v33 }
 0x7b8   :  { %v320_v41 = vor.u32 1.1754944e-38, %v319_v37  ;;  %vm318_vm2 = vcmp.eq.f32.partialorder %v317_v39, 8.507059e+37 }
 0x7bc   :  { %v733_v34 = vpop.eup %732 }
 0x7bd   :  { %v309_v35 = vmul.f32 %v733_v34, %v307_v33  ;;  %vm314_vm15 = vweird.f32 %v733_v34 }
 0x7be   :  { %vm315_vm1 = vmor %vm313_vm0, %vm314_vm15 }
 0x7bf   :  { %v310_v36 = vsub.f32 1.0, %v309_v35 }
 0x7c1   :  { %v311_v38 = vmul.f32 %v733_v34, %v310_v36 }
 0x7c3   :  { %v312_v40 = vadd.f32 %v733_v34, %v311_v38 }
 0x7c5   :  { %v316_v42 = vsel %vm315_vm1, %v733_v34, %v312_v40 }
 0x7c6   :  { %v321_v43 = vsel %vm318_vm2, %v320_v41, %v316_v42 }
 0x7c7   :  { %v323_v44 = vmul.f32 2.0, %v321_v43  ;;  %v325_v48 = vmul.f32 %v321_v43, %v268_v23 }
 0x7c9   :  { %v689_v45 = vadd.f32 -1.0, %v323_v44 }
 0x7cb   :  { %327 = vrot.lane.b32.xlu0 %v689_v45, %s820_s3  ;;  %v481_v45 = vld [vmem:[#allocation2 + $0x6] sm:$0x1] }
 0x83d   :  { %v328_v46 = vpop.permute.xlu0 %327 }
 0x83e   :  { %v330_v47 = vmul.f32 %v328_v46, %v321_v43 }
 0x840   :  { %332 = vrot.lane.b32.xlu1 %v330_v47, %s821_s13 }
 0x8b2   :  { %v333_v49 = vpop.permute.xlu1 %332 }
 0x8b3   :  { %v335_v50 = vadd.f32 %v333_v49, %v325_v48 }
 0x8b5   :  { %734 = vtanh.f32 %v335_v50 }
 0x8bb   :  { %v735_v51 = vpop.eup %734 }
 0x8bc   :  { %338 = vrot.lane.b32.xlu2 %v735_v51, %s820_s3 }
 0x916   :  { %v339_v52 = vpop.permute.xlu2 %338 }
 0x917   :  { %v341_v53 = vmul.f32 %v339_v52, %v321_v43 }
 0x919   :  { %343 = vrot.lane.b32.xlu0 %v341_v53, %s821_s13 }
 0x98b   :  { %v344_v54 = vpop.permute.xlu0 %343 }
 0x98c   :  { %346 = vst.msk [vmem:[#allocation3 + $0x3] sm:$0x1] %vm144_vm5, %v344_v54  ;;  %690 = vmatmul.msk.f32.vlgmr.msrb.gmra.mxu1 %vm77_vm6, %v344_v54 }
 0xa09   :  { %v367_v56 = vpop.f32.mrf.mxu1 }
 0xa0a   :  { %v370_v57 = vadd.f32 %v367_v56, %v347_v55 }
 0xa0c   :  { %v691_v58 = vmul.f32 -1.442695, %v370_v57 }
 0xa0e   :  { %736 = vpow2.f32 %v691_v58 }
 0xa14   :  { %v737_v59 = vpop.eup %736 }
 0xa15   :  { %v374_v60 = vadd.f32 1.0, %v737_v59 }
 0xa17   :  { %738 = vrcp.f32 %v374_v60  ;;  %v386_v0 = vand.u32 2147483648, %v374_v60  ;;  %v384_v2 = vand.u32 2147483647, %v374_v60  ;;  %vm380_vm4 = vweird.f32 %v374_v60 }
 0xa19   :  { %v387_v4 = vor.u32 1.1754944e-38, %v386_v0  ;;  %vm385_vm8 = vcmp.eq.f32.partialorder %v384_v2, 8.507059e+37 }
 0xa1d   :  { %v739_v61 = vpop.eup %738 }
 0xa1e   :  { %v376_v62 = vmul.f32 %v739_v61, %v374_v60  ;;  %vm381_vm3 = vweird.f32 %v739_v61 }
 0xa1f   :  { %vm382_vm7 = vmor %vm380_vm4, %vm381_vm3 }
 0xa20   :  { %v377_v63 = vsub.f32 1.0, %v376_v62 }
 0xa22   :  { %v378_v1 = vmul.f32 %v739_v61, %v377_v63 }
 0xa24   :  { %v379_v3 = vadd.f32 %v739_v61, %v378_v1 }
 0xa26   :  { %v383_v5 = vsel %vm382_vm7, %v739_v61, %v379_v3  ;;  %vm647_vm7 = vcmask 64512  }
 0xa27   :  { %v388_v6 = vsel %vm385_vm8, %v387_v4, %v383_v5 }
 0xa28   :  { %v390_v7 = vmul.f32 2.0, %v388_v6  ;;  %v392_v11 = vmul.f32 %v388_v6, %v335_v50 }
 0xa2a   :  { %v692_v8 = vadd.f32 -1.0, %v390_v7 }
 0xa2c   :  { %394 = vrot.lane.b32.xlu1 %v692_v8, %s820_s3  ;;  %v548_v8 = vld [vmem:[#allocation2 + $0x7] sm:$0x1] }
 0xa9e   :  { %v395_v9 = vpop.permute.xlu1 %394 }
 0xa9f   :  { %v397_v10 = vmul.f32 %v395_v9, %v388_v6 }
 0xaa1   :  { %399 = vrot.lane.b32.xlu2 %v397_v10, %s821_s13 }
 0xafb   :  { %v400_v12 = vpop.permute.xlu2 %399 }
 0xafc   :  { %v402_v13 = vadd.f32 %v400_v12, %v392_v11 }
 0xafe   :  { %740 = vtanh.f32 %v402_v13 }
 0xb04   :  { %v741_v14 = vpop.eup %740 }
 0xb05   :  { %405 = vrot.lane.b32.xlu0 %v741_v14, %s820_s3 }
 0xb77   :  { %v406_v15 = vpop.permute.xlu0 %405 }
 0xb78   :  { %v408_v16 = vmul.f32 %v406_v15, %v388_v6 }
 0xb7a   :  { %410 = vrot.lane.b32.xlu1 %v408_v16, %s821_s13 }
 0xbec   :  { %v411_v17 = vpop.permute.xlu1 %410 }
 0xbed   :  { %413 = vst.msk [vmem:[#allocation3 + $0x4] sm:$0x1] %vm144_vm5, %v411_v17  ;;  %693 = vmatmul.msk.f32.vlgmr.msrb.gmra.mxu2 %vm77_vm6, %v411_v17 }
 0xc70   :  { %v434_v19 = vpop.f32.mrf.mxu2 }
 0xc71   :  { %v437_v20 = vadd.f32 %v434_v19, %v414_v18 }
 0xc73   :  { %v694_v21 = vmul.f32 -1.442695, %v437_v20 }
 0xc75   :  { %742 = vpow2.f32 %v694_v21 }
 0xc7b   :  { %v743_v22 = vpop.eup %742 }
 0xc7c   :  { %v441_v23 = vadd.f32 1.0, %v743_v22 }
 0xc7e   :  { %744 = vrcp.f32 %v441_v23  ;;  %v453_v27 = vand.u32 2147483648, %v441_v23  ;;  %v451_v29 = vand.u32 2147483647, %v441_v23  ;;  %vm447_vm10 = vweird.f32 %v441_v23 }
 0xc80   :  { %v454_v31 = vor.u32 1.1754944e-38, %v453_v27  ;;  %vm452_vm12 = vcmp.eq.f32.partialorder %v451_v29, 8.507059e+37 }
 0xc84   :  { %v745_v24 = vpop.eup %744 }
 0xc85   :  { %v443_v25 = vmul.f32 %v745_v24, %v441_v23  ;;  %vm448_vm9 = vweird.f32 %v745_v24 }
 0xc86   :  { %vm449_vm11 = vmor %vm447_vm10, %vm448_vm9 }
 0xc87   :  { %v444_v26 = vsub.f32 1.0, %v443_v25 }
 0xc89   :  { %v445_v28 = vmul.f32 %v745_v24, %v444_v26 }
 0xc8b   :  { %v446_v30 = vadd.f32 %v745_v24, %v445_v28 }
 0xc8d   :  { %v450_v32 = vsel %vm449_vm11, %v745_v24, %v446_v30 }
 0xc8e   :  { %v455_v33 = vsel %vm452_vm12, %v454_v31, %v450_v32 }
 0xc8f   :  { %v457_v34 = vmul.f32 2.0, %v455_v33  ;;  %v459_v38 = vmul.f32 %v455_v33, %v402_v13 }
 0xc91   :  { %v695_v35 = vadd.f32 -1.0, %v457_v34  ;;  %v619_v34 = vld [vmem:[%s952_s4 + $0x18] sm:$0xff] }
 0xc92   :  { %639 = vmatpush.msra.mxu1 %v619_v34 }
 0xc93   :  { %461 = vrot.lane.b32.xlu2 %v695_v35, %s820_s3  ;;  %v618_v35 = vld [vmem:[%s952_s4 + $0x10] sm:$0xff] }
 0xc94   :  { %640 = vmatpush.msra.mxu1 %v618_v35 }
 0xced   :  { %v462_v36 = vpop.permute.xlu2 %461 }
 0xcee   :  { %v464_v37 = vmul.f32 %v462_v36, %v455_v33  ;;  %v617_v36 = vld [vmem:[%s952_s4 + $0x8] sm:$0xff] }
 0xcef   :  { %641 = vmatpush.msra.mxu1 %v617_v36 }
 0xcf0   :  { %466 = vrot.lane.b32.xlu0 %v464_v37, %s821_s13  ;;  %v616_v37 = vld [vmem:[%s952_s4] sm:$0xff]  ;;  %s822_s4 = smov [#allocation7]  }
 0xcf1   :  { %642 = vmatpush.msra.mxu1 %v616_v37  ;;  %s666_s24 = sshll.u32 %s822_s4, 4  ;;  %s667_s24 = int_to_ptr.vmem [resolvable:$true] %s666_s24 }
 0xd62   :  { %v467_v39 = vpop.permute.xlu0 %466 }
 0xd63   :  { %v469_v40 = vadd.f32 %v467_v39, %v459_v38 }
 0xd65   :  { %746 = vtanh.f32 %v469_v40 }
 0xd6b   :  { %v747_v41 = vpop.eup %746 }
 0xd6c   :  { %472 = vrot.lane.b32.xlu1 %v747_v41, %s820_s3 }
 0xdde   :  { %v473_v42 = vpop.permute.xlu1 %472 }
 0xddf   :  { %v475_v43 = vmul.f32 %v473_v42, %v455_v33 }
 0xde1   :  { %477 = vrot.lane.b32.xlu2 %v475_v43, %s821_s13 }
 0xe3b   :  { %v478_v44 = vpop.permute.xlu2 %477 }
 0xe3c   :  { %480 = vst.msk [vmem:[#allocation3 + $0x5] sm:$0x1] %vm144_vm5, %v478_v44  ;;  %696 = vmatmul.msk.f32.vlgmr.msrb.gmra.mxu3 %vm77_vm6, %v478_v44 }
 0xebf   :  { %v501_v46 = vpop.f32.mrf.mxu3 }
 0xec0   :  { %v504_v47 = vadd.f32 %v501_v46, %v481_v45 }
 0xec2   :  { %v697_v48 = vmul.f32 -1.442695, %v504_v47 }
 0xec4   :  { %748 = vpow2.f32 %v697_v48 }
 0xeca   :  { %v749_v49 = vpop.eup %748 }
 0xecb   :  { %v508_v50 = vadd.f32 1.0, %v749_v49 }
 0xecd   :  { %750 = vrcp.f32 %v508_v50  ;;  %v520_v54 = vand.u32 2147483648, %v508_v50  ;;  %v518_v56 = vand.u32 2147483647, %v508_v50  ;;  %vm514_vm14 = vweird.f32 %v508_v50 }
 0xecf   :  { %v521_v58 = vor.u32 1.1754944e-38, %v520_v54  ;;  %vm519_vm0 = vcmp.eq.f32.partialorder %v518_v56, 8.507059e+37 }
 0xed3   :  { %v751_v51 = vpop.eup %750 }
 0xed4   :  { %v510_v52 = vmul.f32 %v751_v51, %v508_v50  ;;  %vm515_vm13 = vweird.f32 %v751_v51 }
 0xed5   :  { %vm516_vm15 = vmor %vm514_vm14, %vm515_vm13 }
 0xed6   :  { %v511_v53 = vsub.f32 1.0, %v510_v52 }
 0xed8   :  { %v512_v55 = vmul.f32 %v751_v51, %v511_v53 }
 0xeda   :  { %v513_v57 = vadd.f32 %v751_v51, %v512_v55 }
 0xedc   :  { %v517_v59 = vsel %vm516_vm15, %v751_v51, %v513_v57 }
 0xedd   :  { %v522_v60 = vsel %vm519_vm0, %v521_v58, %v517_v59 }
 0xede   :  { %v524_v61 = vmul.f32 2.0, %v522_v60  ;;  %v526_v1 = vmul.f32 %v522_v60, %v469_v40  ;;  %v711_v40 = vld [vmem:[%s953_s5] ss:$0 sm:$0xff] }
 0xee0   :  { %v698_v62 = vadd.f32 -1.0, %v524_v61 }
 0xee2   :  { %528 = vrot.lane.b32.xlu0 %v698_v62, %s820_s3 }
 0xf54   :  { %v529_v63 = vpop.permute.xlu0 %528 }
 0xf55   :  { %v531_v0 = vmul.f32 %v529_v63, %v522_v60 }
 0xf57   :  { %533 = vrot.lane.b32.xlu1 %v531_v0, %s821_s13 }
 0xfc9   :  { %v534_v2 = vpop.permute.xlu1 %533 }
 0xfca   :  { %v536_v3 = vadd.f32 %v534_v2, %v526_v1 }
 0xfcc   :  { %752 = vtanh.f32 %v536_v3 }
 0xfd2   :  { %v753_v4 = vpop.eup %752 }
 0xfd3   :  { %539 = vrot.lane.b32.xlu2 %v753_v4, %s820_s3 }
0x102d   :  { %v540_v5 = vpop.permute.xlu2 %539 }
0x102e   :  { %v542_v6 = vmul.f32 %v540_v5, %v522_v60 }
0x1030   :  { %544 = vrot.lane.b32.xlu0 %v542_v6, %s821_s13 }
0x10a2   :  { %v545_v7 = vpop.permute.xlu0 %544 }
0x10a3   :  { %547 = vst.msk [vmem:[#allocation3 + $0x6] sm:$0x1] %vm144_vm5, %v545_v7  ;;  %699 = vmatmul.msk.f32.vlgmr.msra.gmra.mxu0 %vm77_vm6, %v545_v7 }
0x1120   :  { %v568_v9 = vpop.f32.mrf.mxu0 }
0x1121   :  { %v571_v10 = vadd.f32 %v568_v9, %v548_v8 }
0x1123   :  { %v700_v11 = vmul.f32 -1.442695, %v571_v10 }
0x1125   :  { %754 = vpow2.f32 %v700_v11 }
0x112b   :  { %v755_v12 = vpop.eup %754 }
0x112c   :  { %v575_v13 = vadd.f32 1.0, %v755_v12 }
0x112e   :  { %756 = vrcp.f32 %v575_v13  ;;  %v587_v17 = vand.u32 2147483648, %v575_v13  ;;  %v585_v19 = vand.u32 2147483647, %v575_v13  ;;  %vm581_vm2 = vweird.f32 %v575_v13 }
0x1130   :  { %v588_v21 = vor.u32 1.1754944e-38, %v587_v17  ;;  %vm586_vm4 = vcmp.eq.f32.partialorder %v585_v19, 8.507059e+37 }
0x1134   :  { %v757_v14 = vpop.eup %756 }
0x1135   :  { %v577_v15 = vmul.f32 %v757_v14, %v575_v13  ;;  %vm582_vm1 = vweird.f32 %v757_v14 }
0x1136   :  { %vm583_vm3 = vmor %vm581_vm2, %vm582_vm1 }
0x1137   :  { %v578_v16 = vsub.f32 1.0, %v577_v15 }
0x1139   :  { %v579_v18 = vmul.f32 %v757_v14, %v578_v16 }
0x113b   :  { %v580_v20 = vadd.f32 %v757_v14, %v579_v18 }
0x113d   :  { %v584_v22 = vsel %vm583_vm3, %v757_v14, %v580_v20 }
0x113e   :  { %v589_v23 = vsel %vm586_vm4, %v588_v21, %v584_v22 }
0x113f   :  { %v591_v24 = vmul.f32 2.0, %v589_v23  ;;  %v593_v28 = vmul.f32 %v589_v23, %v536_v3 }
0x1141   :  { %v701_v25 = vadd.f32 -1.0, %v591_v24 }
0x1143   :  { %595 = vrot.lane.b32.xlu1 %v701_v25, %s820_s3 }
0x11b5   :  { %v596_v26 = vpop.permute.xlu1 %595 }
0x11b6   :  { %v598_v27 = vmul.f32 %v596_v26, %v589_v23 }
0x11b8   :  { %600 = vrot.lane.b32.xlu2 %v598_v27, %s821_s13 }
0x1212   :  { %v601_v29 = vpop.permute.xlu2 %600 }
0x1213   :  { %v603_v30 = vadd.f32 %v601_v29, %v593_v28 }
0x1215   :  { %758 = vtanh.f32 %v603_v30 }
0x121b   :  { %v759_v31 = vpop.eup %758 }
0x121c   :  { %606 = vrot.lane.b32.xlu0 %v759_v31, %s820_s3 }
0x128e   :  { %v607_v32 = vpop.permute.xlu0 %606 }
0x128f   :  { %v609_v33 = vmul.f32 %v607_v32, %v589_v23 }
0x1291   :  { %611 = vrot.lane.b32.xlu1 %v609_v33, %s821_s13 }
0x1303   :  { %v612_v38 = vpop.permute.xlu1 %611 }
0x1304   :  { %614 = vst.msk [vmem:[#allocation3 + $0x7] sm:$0x1] %vm144_vm5, %v612_v38 }
0x130b   :  { %v615_v39 = vld [vmem:[#allocation3] sm:$0xff] }
0x130c   :  { %702 = vmatmul.msk.f32.vlgmr.msra.gmra.mxu1 %vm77_vm6, %v615_v39 }
0x1389   :  { %v644_v41 = vpop.f32.mrf.mxu1 }
0x138a   :  { %v645_v42 = vadd.f32 %v711_v40, %v644_v41 }
0x138c   :  { %v648_v43 = vsel %vm647_vm7, %v645_v42, -inf }
0x138d   :  { %649 = vmax.xlane.f32.xlu2 %v648_v43 }
0x1400   :  { %v650_v44 = vpop.xlane.xlu2 %649 }
0x1401   :  { %v651_v45 = vsub.f32 %v645_v42, %v650_v44 }
0x1403   :  { %v652_v46 = vmul.f32 1.442695, %v651_v45 }
0x1405   :  { %760 = vpow2.f32 %v652_v46 }
0x140b   :  { %v761_v47 = vpop.eup %760 }
0x140c   :  { %v654_v48 = vsel %vm647_vm7, %v761_v47, 0.0 }
0x140d   :  { %655 = vadd.xlane.f32.xlu0 %v654_v48 }
0x1480   :  { %v656_v49 = vpop.xlane.xlu0 %655 }
0x1481   :  { %762 = vlog2.f32 %v656_v49 }
0x1487   :  { %v763_v50 = vpop.eup %762 }
0x1488   :  { %v658_v51 = vmul.f32 0.6931472, %v763_v50 }
0x148a   :  { %v659_v52 = vsub.f32 %v651_v45, %v658_v51 }
0x148c   :  { %660 = vst.msk [vmem:[#allocation7] sm:$0xff] %vm647_vm7, %v659_v52 }
0x148d   :  { %671 = dma.vmem_to_hbm [thread:$0]  %s667_s24, 128, %s669_s26, [#allocation6]  }
0x148e   :  { %814 = dma.done.wait [#allocation6], 128  }
0x148f   :  { %815 = vsyncadd [#allocation6], 4294967168 }
0x1490   :  { %676 = vsyncpa [#allocation5], 1 }
0x1491   :  { %677 = vsyncpa [#allocation6], 1 }

</bundles_post_ra>
